<compile_context>
chip_gen: v7x
topology: tpu7x:2x2x1
jax: 0.10.0
libtpu: 0.0.40
codegen_flags: <defaults>
</compile_context>

<pallas_src>
import jax
import jax.numpy as jnp
from jax.experimental import pallas as pl
from jax.experimental.pallas import tpu as pltpu

_LANES = 128


def _round_up(x, m):
    return ((x + m - 1) // m) * m


# ----------------------------------------------------------------------------
# Kernel
# ----------------------------------------------------------------------------
def _make_flow_kernel(n_layers, has_prev):
    """Fused L-layer planar-flow kernel (feature-major slabs)."""

    def kernel(*refs):
        if has_prev:
            p_ref, z_ref, prev_ref, fz_ref, ld_ref = refs
        else:
            p_ref, z_ref, fz_ref, ld_ref = refs
            prev_ref = None

        # p_ref : SMEM (6*L + 1,) = L x [w0, w1, u_hat0, u_hat1, b, w.u_hat] + [scalar carry]
        # z_ref : VMEM (2, rows, 128)   feature-major slabs of samples
        # prev_ref (opt): VMEM (rows, 128) incoming sum_log_abs_det_jacobians
        # fz_ref: VMEM (2, rows, 128)   transformed samples
        # ld_ref: VMEM (rows, 128)      accumulated log|det|

        z0 = z_ref[0]
        z1 = z_ref[1]

        if has_prev:
            acc = prev_ref[...]
        else:
            acc = jnp.full(ld_ref.shape, p_ref[6 * n_layers], dtype=jnp.float32)

        # Statically unrolled layer loop: z stays in registers/VMEM, one HBM pass
        # for the whole stack.  log|det| of layer l uses t of layer l's *input*,
        # so det is computed before z is updated.
        for l in range(n_layers):
            w0 = p_ref[6 * l + 0]
            w1 = p_ref[6 * l + 1]
            u0 = p_ref[6 * l + 2]
            u1 = p_ref[6 * l + 3]
            b = p_ref[6 * l + 4]
            wu = p_ref[6 * l + 5]          # w . u_hat (precomputed in wrapper)

            t = jnp.tanh(z0 * w0 + z1 * w1 + b)
            det = 1.0 + (1.0 - t * t) * wu          # rank-1 det structure
            acc = acc + jnp.log(jnp.abs(det) + 1e-6)
            z0 = z0 + u0 * t
            z1 = z1 + u1 * t

        fz_ref[0] = z0
        fz_ref[1] = z1
        ld_ref[...] = acc

    return kernel


# ----------------------------------------------------------------------------
# pallas_call wrapper
# ----------------------------------------------------------------------------
def _choose_rows_per_tile(num_rows, max_samples_per_step):
    """Rows (of 128 samples) per grid step.

    Big tiles to amortize the ~0.35us/step overhead; when everything fits in a
    couple of tiles, split into exactly 2 even steps so both v7x TensorCores get
    equal work (negligible cost on single-TC v5e/v6e).
    """
    if num_rows <= 8:
        return num_rows                                  # small full-extent block
    max_rows = max(8, (max_samples_per_step // _LANES) // 8 * 8)
    if num_rows <= max_rows:
        if num_rows >= 32:
            return min(max_rows, _round_up((num_rows + 1) // 2, 8))  # 2 even steps
        return num_rows                                  # single full-extent step
    return max_rows


def _flow_pallas(zfm, params, prev, rows_per_tile, n_layers):
    _, num_rows, lanes = zfm.shape
    has_prev = prev is not None
    grid = (pl.cdiv(num_rows, rows_per_tile),)           # ragged last block is OK

    in_specs = [
        pl.BlockSpec(memory_space=pltpu.MemorySpace.SMEM),                  # params
        pl.BlockSpec((2, rows_per_tile, lanes), lambda i: (0, i, 0)),       # z
    ]
    args = [params, zfm]
    if has_prev:
        in_specs.append(pl.BlockSpec((rows_per_tile, lanes), lambda i: (i, 0)))
        args.append(prev)

    n_samples = num_rows * lanes
    arrays_per_sample = 2 + 2 + 1 + (1 if has_prev else 0)   # z + fz + ld (+ prev)
    cost = pl.CostEstimate(
        flops=10 * n_samples * n_layers,
        transcendentals=2 * n_samples * n_layers,
        bytes_accessed=4 * arrays_per_sample * n_samples,
    )

    block_bytes = rows_per_tile * lanes * 4 * arrays_per_sample
    vmem_limit = int(min(max(32 << 20, 3 * block_bytes), 60 << 20))

    return pl.pallas_call(
        _make_flow_kernel(n_layers, has_prev),
        out_shape=(
            jax.ShapeDtypeStruct((2, num_rows, lanes), jnp.float32),
            jax.ShapeDtypeStruct((num_rows, lanes), jnp.float32),
        ),
        grid=grid,
        in_specs=in_specs,
        out_specs=(
            pl.BlockSpec((2, rows_per_tile, lanes), lambda i: (0, i, 0)),   # f_z
            pl.BlockSpec((rows_per_tile, lanes), lambda i: (i, 0)),         # logdet
        ),
        compiler_params=pltpu.CompilerParams(
            dimension_semantics=("parallel",),
            vmem_limit_bytes=vmem_limit,
        ),
        cost_estimate=cost,
    )(*args)


# ----------------------------------------------------------------------------
# Scalar parameter glue (u_hat) — plain JAX
# ----------------------------------------------------------------------------
def _flow_params(us, ws, bs, normalised_u, base_scalar):
    """Flat (6L+1,) f32 params: L x [w0, w1, u_hat0, u_hat1, b, w.u_hat] + [base]."""
    us = jnp.asarray(us, jnp.float32).reshape(-1, 2)
    ws = jnp.asarray(ws, jnp.float32).reshape(-1, 2)
    bs = jnp.asarray(bs, jnp.float32).reshape(-1)
    u_hat = us
    if normalised_u:
        wtu = jnp.sum(ws * us, axis=-1, keepdims=True)
        m_wtu = -1.0 + jax.nn.softplus(wtu)               # stable log1p(exp(.))
        u_hat = us + (m_wtu - wtu) * ws / jnp.sum(ws * ws, axis=-1, keepdims=True)
    wu = jnp.sum(ws * u_hat, axis=-1, keepdims=True)
    per_layer = jnp.concatenate([ws, u_hat, bs[:, None], wu], axis=-1)      # (L, 6)
    base = jnp.asarray(base_scalar, jnp.float32).reshape(1)
    return jnp.concatenate([per_layer.reshape(-1), base]).astype(jnp.float32)


# ----------------------------------------------------------------------------
# Feature-major entry point (fast path for flow stacks)
# ----------------------------------------------------------------------------
def planar_flow_feature_major(zfm, us, ws, bs, normalised_u=True,
                              sum_log_abs_det_jacobians=None,
                              max_samples_per_step=256 * 1024):
    """zfm: (2, rows, 128) feature-major slabs. us/ws: (L,1,2) or (L,2); bs: (L,) or (L,1).

    Returns (f_zfm (2, rows, 128), new_sum_log_abs_det (rows, 128)); the carry
    (array or scalar) is fused into the kernel.
    """
    zfm = jnp.asarray(zfm, jnp.float32)
    assert zfm.ndim == 3 and zfm.shape[0] == 2 and zfm.shape[2] == _LANES
    num_rows = zfm.shape[1]

    prev = None
    base = 0.0
    s = sum_log_abs_det_jacobians
    if s is None or isinstance(s, (int, float)):
        base = 0.0 if s is None else float(s)
    else:
        s = jnp.asarray(s, jnp.float32)
        if s.ndim == 0:
            base = s
        else:
            prev = s.reshape(num_rows, _LANES)

    params = _flow_params(us, ws, bs, normalised_u, base)
    n_layers = (params.shape[0] - 1) // 6

    # Rows must be a multiple of 8 when above 8 (sublane tiling); pad the few
    # missing rows only (never to a tile multiple — the grid handles raggedness).
    pad_rows = 0
    if num_rows > 8 and num_rows % 8 != 0:
        pad_rows = _round_up(num_rows, 8) - num_rows
        zfm = jnp.pad(zfm, ((0, 0), (0, pad_rows), (0, 0)))
        if prev is not None:
            prev = jnp.pad(prev, ((0, pad_rows), (0, 0)))
    rows = num_rows + pad_rows

    rows_per_tile = _choose_rows_per_tile(rows, max_samples_per_step)
    fz, ld = _flow_pallas(zfm, params, prev, rows_per_tile, n_layers)

    if pad_rows:
        fz = fz[:, :num_rows, :]
        ld = ld[:num_rows, :]
    return fz, ld


# ----------------------------------------------------------------------------
# (N, 2) PyTorch-layout entry points
# ----------------------------------------------------------------------------
def planar_flow(z, us, ws, bs, normalised_u=True,
                sum_log_abs_det_jacobians=None,
                max_samples_per_step=256 * 1024):
    """Fused L-layer planar flow on (N, 2) input. One boundary layout pass per
    flow (not per layer). Returns (f_z (N,2), sum_log_abs_det_jacobians (N,))."""
    if isinstance(z, tuple):
        z, sum_log_abs_det_jacobians = z
    z = jnp.asarray(z, jnp.float32)
    n = z.shape[0]
    assert z.shape[1] == 2

    # Pad sample axis to a 128-lane multiple (and 1024 when that yields >8 rows,
    # so rows are an 8-multiple); fused by XLA with the feature-major transpose.
    n_pad = _round_up(n, _LANES)
    if n_pad // _LANES > 8:
        n_pad = _round_up(n, 8 * _LANES)
    rows = n_pad // _LANES

    zin = jnp.pad(z, ((0, n_pad - n), (0, 0))) if n_pad != n else z
    zfm = zin.T.reshape(2, rows, _LANES)

    prev = sum_log_abs_det_jacobians
    if prev is not None and not isinstance(prev, (int, float)):
        prev = jnp.asarray(prev, jnp.float32)
        if prev.ndim > 0:
            assert prev.shape == (n,)
            if n_pad != n:
                prev = jnp.pad(prev, (0, n_pad - n))
            prev = prev.reshape(rows, _LANES)

    fzfm, ld = planar_flow_feature_major(
        zfm, us, ws, bs, normalised_u=normalised_u,
        sum_log_abs_det_jacobians=prev,
        max_samples_per_step=max_samples_per_step)

    f_z = fzfm.reshape(2, n_pad).T[:n]
    sum_logdet = ld.reshape(n_pad)[:n]
    return f_z, sum_logdet


def planar_transform(z, u, w, b, normalised_u=True,
                     sum_log_abs_det_jacobians=None,
                     max_samples_per_step=256 * 1024):
    """Single PlanarTransform layer, matching the PyTorch module forward.
    z may be a tuple (z, sum_log_abs_det_jacobians)."""
    if isinstance(z, tuple):
        z, sum_log_abs_det_jacobians = z
    return planar_flow(
        z,
        jnp.reshape(jnp.asarray(u, jnp.float32), (1, 2)),
        jnp.reshape(jnp.asarray(w, jnp.float32), (1, 2)),
        jnp.reshape(jnp.asarray(b, jnp.float32), (1,)),
        normalised_u=normalised_u,
        sum_log_abs_det_jacobians=sum_log_abs_det_jacobians,
        max_samples_per_step=max_samples_per_step)


# ----------------------------------------------------------------------------
# Pure-JAX reference (mirrors the PyTorch forward)
# ----------------------------------------------------------------------------
def _reference_layer(z, u, w, b, normalised_u=True):
    wtu = (w @ u.T).squeeze()
    u_hat = u
    if normalised_u:
        m_wtu = -1.0 + jnp.log1p(jnp.exp(wtu))
        u_hat = u + (m_wtu - wtu) * w / (w @ w.T)
    lin = z @ w.T + b
    f_z = z + u_hat * jnp.tanh(lin)
    psi = (1.0 - jnp.tanh(lin) ** 2) @ w
    det = 1.0 + psi @ u_hat.T
    logd = jnp.log(jnp.abs(det) + 1e-6).squeeze()
    return f_z, logd


def _reference_flow(z, us, ws, bs, normalised_u=True, sum0=0.0):
    s = sum0
    for l in range(us.shape[0]):
        z, ld = _reference_layer(z, us[l], ws[l], bs[l], normalised_u)
        s = s + ld
    return z, s


if __name__ == "__main__":
    key = jax.random.PRNGKey(0)
    k_u, k_w, k_z, k_s = jax.random.split(key, 4)

    init_sigma = 0.01
    L = 4
    us = (init_sigma * jax.random.normal(k_u, (L, 1, 2))).astype(jnp.float32)
    ws = (init_sigma * jax.random.normal(k_w, (L, 1, 2))).astype(jnp.float32)
    bs = jnp.zeros((L, 1), dtype=jnp.float32)

    # N = 256 (exact 128-multiple), 300 (ragged tail), 5120 (multi-step grid with
    # a partial last block: exercises the cdiv / masked-writeback path).
    for N in (256, 300, 5120):
        z = jax.random.normal(jax.random.fold_in(k_z, N), (N, 2), dtype=jnp.float32)

        # --- single PlanarTransform layer, tuple input (as in the nn.Module) ---
        prev = jax.random.normal(jax.random.fold_in(k_s, N), (N,), dtype=jnp.float32)
        f1, s1 = planar_transform((z, prev), us[0], ws[0], bs[0])
        f1 = jax.block_until_ready(f1)
        s1 = jax.block_until_ready(s1)
        fr, lr = _reference_layer(z, us[0], ws[0], bs[0])
        assert f1.shape == (N, 2) and s1.shape == (N,)
        assert jnp.allclose(f1, fr, atol=1e-5, rtol=1e-5)
        assert jnp.allclose(s1, prev + lr, atol=1e-5, rtol=1e-5)

        # --- fused L-layer flow stack: one pallas_call, one HBM pass ---
        fz, sld = planar_flow(z, us, ws, bs)
        fz = jax.block_until_ready(fz)
        sld = jax.block_until_ready(sld)
        fzr, sldr = _reference_flow(z, us, ws, bs)
        assert fz.shape == (N, 2) and sld.shape == (N,)
        assert jnp.allclose(fz, fzr, atol=1e-5, rtol=1e-5)
        assert jnp.allclose(sld, sldr, atol=1e-5, rtol=1e-5)

    print("KERNEL_OK")
</pallas_src>

<mosaic_0001>
module attributes {stable_mosaic.version = 11 : i64} {
  func.func @kernel(%arg0: i32, %arg1: memref<7xf32, #tpu.memory_space<smem>>, %arg2: memref<2x2x128xf32, #tpu.memory_space<vmem>>, %arg3: memref<2x128xf32, #tpu.memory_space<vmem>>, %arg4: memref<2x2x128xf32, #tpu.memory_space<vmem>>, %arg5: memref<2x128xf32, #tpu.memory_space<vmem>>) attributes {dimension_semantics = [#tpu.dimension_semantics<parallel>], iteration_bounds = array<i64: 1>, scalar_prefetch = 0 : i64, scratch_operands = 0 : i64, tpu.core_type = #tpu.core_type<tc>, window_params = [{transform_indices = @transform_0, window_bounds = array<i64: 7>}, {transform_indices = @transform_1, window_bounds = array<i64: 2, 2, 128>}, {transform_indices = @transform_2, window_bounds = array<i64: 2, 128>}, {transform_indices = @transform_3, window_bounds = array<i64: 2, 2, 128>}, {transform_indices = @transform_4, window_bounds = array<i64: 2, 128>}]} {
    %c0 = arith.constant 0 : index
    %c0_0 = arith.constant 0 : index
    %c0_1 = arith.constant 0 : index
    %0 = vector.load %arg2[%c0, %c0_0, %c0_1] : memref<2x2x128xf32, #tpu.memory_space<vmem>>, vector<1x2x128xf32>
    %1 = vector.shape_cast %0 : vector<1x2x128xf32> to vector<2x128xf32>
    %c1 = arith.constant 1 : index
    %c0_2 = arith.constant 0 : index
    %c0_3 = arith.constant 0 : index
    %2 = vector.load %arg2[%c1, %c0_2, %c0_3] : memref<2x2x128xf32, #tpu.memory_space<vmem>>, vector<1x2x128xf32>
    %3 = vector.shape_cast %2 : vector<1x2x128xf32> to vector<2x128xf32>
    %c0_4 = arith.constant 0 : index
    %c0_5 = arith.constant 0 : index
    %4 = vector.load %arg3[%c0_4, %c0_5] : memref<2x128xf32, #tpu.memory_space<vmem>>, vector<2x128xf32>
    %c0_6 = arith.constant 0 : index
    %5 = memref.load %arg1[%c0_6] : memref<7xf32, #tpu.memory_space<smem>>
    %c1_7 = arith.constant 1 : index
    %6 = memref.load %arg1[%c1_7] : memref<7xf32, #tpu.memory_space<smem>>
    %c2 = arith.constant 2 : index
    %7 = memref.load %arg1[%c2] : memref<7xf32, #tpu.memory_space<smem>>
    %c3 = arith.constant 3 : index
    %8 = memref.load %arg1[%c3] : memref<7xf32, #tpu.memory_space<smem>>
    %c4 = arith.constant 4 : index
    %9 = memref.load %arg1[%c4] : memref<7xf32, #tpu.memory_space<smem>>
    %c5 = arith.constant 5 : index
    %10 = memref.load %arg1[%c5] : memref<7xf32, #tpu.memory_space<smem>>
    %11 = vector.broadcast %5 : f32 to vector<2x128xf32>
    %12 = arith.mulf %1, %11 : vector<2x128xf32>
    %13 = vector.broadcast %6 : f32 to vector<2x128xf32>
    %14 = arith.mulf %3, %13 : vector<2x128xf32>
    %15 = arith.addf %12, %14 : vector<2x128xf32>
    %16 = vector.broadcast %9 : f32 to vector<2x128xf32>
    %17 = arith.addf %15, %16 : vector<2x128xf32>
    %18 = math.tanh %17 : vector<2x128xf32>
    %19 = arith.mulf %18, %18 : vector<2x128xf32>
    %cst = arith.constant 1.000000e+00 : f32
    %20 = vector.broadcast %cst : f32 to vector<2x128xf32>
    %21 = arith.subf %20, %19 : vector<2x128xf32>
    %22 = vector.broadcast %10 : f32 to vector<2x128xf32>
    %23 = arith.mulf %21, %22 : vector<2x128xf32>
    %cst_8 = arith.constant 1.000000e+00 : f32
    %24 = vector.broadcast %cst_8 : f32 to vector<2x128xf32>
    %25 = arith.addf %24, %23 : vector<2x128xf32>
    %26 = math.absf %25 : vector<2x128xf32>
    %cst_9 = arith.constant 9.99999997E-7 : f32
    %27 = vector.broadcast %cst_9 : f32 to vector<2x128xf32>
    %28 = arith.addf %26, %27 : vector<2x128xf32>
    %29 = math.log %28 : vector<2x128xf32>
    %30 = arith.addf %4, %29 : vector<2x128xf32>
    %31 = vector.broadcast %7 : f32 to vector<2x128xf32>
    %32 = arith.mulf %31, %18 : vector<2x128xf32>
    %33 = arith.addf %1, %32 : vector<2x128xf32>
    %34 = vector.broadcast %8 : f32 to vector<2x128xf32>
    %35 = arith.mulf %34, %18 : vector<2x128xf32>
    %36 = arith.addf %3, %35 : vector<2x128xf32>
    %c0_10 = arith.constant 0 : index
    %c0_11 = arith.constant 0 : index
    %c0_12 = arith.constant 0 : index
    %37 = vector.load %arg4[%c0_10, %c0_11, %c0_12] : memref<2x2x128xf32, #tpu.memory_space<vmem>>, vector<1x2x128xf32>
    %38 = vector.shape_cast %37 : vector<1x2x128xf32> to vector<2x128xf32>
    %39 = vector.shape_cast %33 : vector<2x128xf32> to vector<1x2x128xf32>
    tpu.vector_store %arg4[%c0_10, %c0_11, %c0_12], %39 {strides = array<i32>} : memref<2x2x128xf32, #tpu.memory_space<vmem>>, vector<1x2x128xf32>,
    %c1_13 = arith.constant 1 : index
    %c0_14 = arith.constant 0 : index
    %c0_15 = arith.constant 0 : index
    %40 = vector.load %arg4[%c1_13, %c0_14, %c0_15] : memref<2x2x128xf32, #tpu.memory_space<vmem>>, vector<1x2x128xf32>
    %41 = vector.shape_cast %40 : vector<1x2x128xf32> to vector<2x128xf32>
    %42 = vector.shape_cast %36 : vector<2x128xf32> to vector<1x2x128xf32>
    tpu.vector_store %arg4[%c1_13, %c0_14, %c0_15], %42 {strides = array<i32>} : memref<2x2x128xf32, #tpu.memory_space<vmem>>, vector<1x2x128xf32>,
    %c0_16 = arith.constant 0 : index
    %c0_17 = arith.constant 0 : index
    %43 = vector.load %arg5[%c0_16, %c0_17] : memref<2x128xf32, #tpu.memory_space<vmem>>, vector<2x128xf32>
    tpu.vector_store %arg5[%c0_16, %c0_17], %30 {strides = array<i32>} : memref<2x128xf32, #tpu.memory_space<vmem>>, vector<2x128xf32>,
    return
  }
  func.func @transform_0(%arg0: i32) -> i32 {
    %c0_i32 = arith.constant 0 : i32
    %c0_i32_0 = arith.constant 0 : i32
    return %c0_i32 : i32
  }
  func.func @transform_1(%arg0: i32) -> (i32, i32, i32) {
    %c0_i32 = arith.constant 0 : i32
    %c0_i32_0 = arith.constant 0 : i32
    %c0_i32_1 = arith.constant 0 : i32
    return %c0_i32, %arg0, %c0_i32_0 : i32, i32, i32
  }
  func.func @transform_2(%arg0: i32) -> (i32, i32) {
    %c0_i32 = arith.constant 0 : i32
    %c0_i32_0 = arith.constant 0 : i32
    return %arg0, %c0_i32 : i32, i32
  }
  func.func @transform_3(%arg0: i32) -> (i32, i32, i32) {
    %c0_i32 = arith.constant 0 : i32
    %c0_i32_0 = arith.constant 0 : i32
    %c0_i32_1 = arith.constant 0 : i32
    return %c0_i32, %arg0, %c0_i32_0 : i32, i32, i32
  }
  func.func @transform_4(%arg0: i32) -> (i32, i32) {
    %c0_i32 = arith.constant 0 : i32
    %c0_i32_0 = arith.constant 0 : i32
    return %arg0, %c0_i32 : i32, i32
  }
}

</mosaic_0001>

<bundles_post_ra>
// kernel: tpu_custom_call.1
= control target key start
LH: loop header
LB: loop body
LE: loop exit
PB: predicated region body
PF: predicated region fallthrough
CT: control target
= control target key end

     0   :  { %10 = vsyncpa [#allocation5], 0  ;;  %s300_s0 = inlined_call_operand.hbm [shape: f32[7], index: 0, kind: input, shape index: {}]   ;;  %s301_s1 = inlined_call_operand.hbm [shape: f32[2,2,128], index: 1, kind: input, shape index: {}]   ;;  %s302_s2 = inlined_call_operand.vmem [shape: f32[2,128], index: 2, kind: input, shape index: {}]   ;;  %s303_s3 = inlined_call_operand.hbm [shape: f32[2,2,128], index: 3, kind: output, shape index: {0}]   ;;  %s304_s4 = inlined_call_operand.hbm [shape: f32[2,128], index: 4, kind: output, shape index: {1}]  }
   0x1   :  { %11 = vsyncpa [#allocation3], 0 }
   0x2   :  { %12 = vsyncpa [#allocation4], 0 }
   0x3   :  { %13 = vsyncpa [#allocation9], 0  ;;  %s128_s17 = scalar_lea.hbm %s300_s0, 16 }
   0x4   :  { %p129_p0 = scmp.ne.s32.totalorder %s300_s0, %s128_s17  ;;  %p132_p1 = scmp.lt.u32.totalorder %s128_s17, %s300_s0 }
   0x6   :  { %p134_p2 = pnand %p132_p1, %p129_p0 }
   0x8   :  { %137 = shalt.err (!%p134_p2)
}
   0x9   :  { %s212_s22 = smov [#allocation2]   ;;  %s213_s25 = smov [#allocation6]  }
   0xa   :  { %21 = dma.hbm_to_smem %s300_s0, 16, %s212_s22, [#allocation5]  }
   0xb   :  { %s27_s26 = sshll.u32 %s213_s25, 4  ;;  %s138_s29 = scalar_lea.hbm %s301_s1, 64  ;;  %s28_s26 = int_to_ptr.vmem [resolvable:$true] %s27_s26 }
   0xc   :  { %p139_p3 = scmp.ne.s32.totalorder %s301_s1, %s138_s29  ;;  %p142_p4 = scmp.lt.u32.totalorder %s138_s29, %s301_s1 }
   0xe   :  { %p144_p5 = pnand %p142_p4, %p139_p3 }
  0x10   :  { %147 = shalt.err (!%p144_p5)
}
  0x11   :  { %s148_s8 = scalar_lea.vmem %s28_s26, 64  ;;  %p153_p7 = scmp.lt.s32.totalorder %s28_s26, %s28_s26 }
  0x12   :  { %p149_p6 = scmp.ne.s32.totalorder %s28_s26, %s148_s8  ;;  %p154_p8 = scmp.lt.s32.totalorder %s148_s8, %s148_s8 }
  0x14   :  { %p155_p9 = por %p154_p8, %p153_p7 }
  0x16   :  { %p156_p10 = pnand %p155_p9, %p149_p6 }
  0x18   :  { %159 = shalt.err (!%p156_p10)
}
  0x19   :  { %s214_s0 = smov 32   ;;  %s215_s9 = smov 2  }
  0x1a   :  { %33 = dma.hbm_to_vmem [thread:$0]  %s301_s1, 64, %s28_s26, [#allocation3], %s214_s0, %s214_s0, %s215_s9  }
  0x1b   :  { %204 = dma.done.wait [#allocation5], 16  }
  0x1c   :  { %205 = vsyncadd [#allocation5], 4294967280 }
  0x1d   :  { %206 = dma.done.wait [#allocation3], 64  }
  0x1e   :  { %207 = vsyncadd [#allocation3], 4294967232 }
  0x1f   :  { %42 = sfence }
  0x20   :  { %s47_s12 = sld [smem:[#allocation2]]  ;;  %s113_s13 = sld [smem:[#allocation2 + $0x1]]  ;;  %v43_v0 = vld [vmem:[#allocation6] sm:$0x3]  ;;  %v45_v1 = vld [vmem:[#allocation6 + $0x2] sm:$0x3] }
  0x21   :  { %s116_s14 = sld [smem:[#allocation2 + $0x4]]  ;;  %s114_s15 = sld [smem:[#allocation2 + $0x2]] }
  0x22   :  { %s115_s1 = sld [smem:[#allocation2 + $0x3]]  ;;  %s117_s16 = sld [smem:[#allocation2 + $0x5]] }
  0x23   :  { %s216_s17 = smov [#allocation7]  }
  0x24   :  { %s86_s18 = sshll.u32 %s216_s17, 4  ;;  %s87_s18 = int_to_ptr.vmem [resolvable:$true] %s86_s18 }
  0x25   :  { %s160_s19 = scalar_lea.vmem %s87_s18, 64  ;;  %p165_p12 = scmp.lt.s32.totalorder %s87_s18, %s87_s18 }
  0x26   :  { %v53_v2 = vstv %s47_s12  ;;  %v55_v4 = vstv %s113_s13  ;;  %p161_p11 = scmp.ne.s32.totalorder %s87_s18, %s160_s19  ;;  %p166_p13 = scmp.lt.s32.totalorder %s160_s19, %s160_s19 }
  0x27   :  { %v54_v3 = vmul.f32 %v53_v2, %v43_v0  ;;  %v56_v5 = vmul.f32 %v55_v4, %v45_v1  ;;  %v58_v6 = vstv %s116_s14  ;;  %v71_v9 = vstv %s114_s15 }
  0x28   :  { %v74_v10 = vstv %s115_s1  ;;  %v63_v15 = vstv %s117_s16  ;;  %p167_p0 = por %p166_p13, %p165_p12 }
  0x29   :  { %v57_v7 = vadd.f32 %v56_v5, %v54_v3 }
  0x2a   :  { %p168_p1 = pnand %p167_p0, %p161_p11 }
  0x2b   :  { %v59_v8 = vadd.f32 %v58_v6, %v57_v7 }
  0x2d   :  { %124 = vtanh.f32 %v59_v8 }
  0x37   :  { %v125_v11 = vpop.eup %124 }
  0x38   :  { %v72_v12 = vmul.f32 %v125_v11, %v71_v9  ;;  %v75_v13 = vmul.f32 %v125_v11, %v74_v10  ;;  %v61_v14 = vmul.f32 %v125_v11, %v125_v11 }
  0x3a   :  { %v73_v16 = vadd.f32 %v72_v12, %v43_v0  ;;  %v76_v17 = vadd.f32 %v75_v13, %v45_v1  ;;  %v62_v18 = vsub.f32 1.0, %v61_v14 }
  0x3c   :  { %77 = vst [vmem:[#allocation7] sm:$0x3] %v73_v16  ;;  %79 = vst [vmem:[#allocation7 + $0x2] sm:$0x3] %v76_v17  ;;  %v64_v19 = vmul.f32 %v63_v15, %v62_v18 }
  0x3d   :  { %171 = shalt.err (!%p168_p1)
}
  0x3e   :  { %s172_s22 = scalar_lea.hbm %s303_s3, 64 }
  0x3f   :  { %p173_p2 = scmp.ne.s32.totalorder %s303_s3, %s172_s22  ;;  %p176_p3 = scmp.lt.u32.totalorder %s172_s22, %s303_s3 }
  0x41   :  { %p178_p4 = pnand %p176_p3, %p173_p2 }
  0x43   :  { %181 = shalt.err (!%p178_p4)
}
  0x44   :  { %92 = dma.vmem_to_hbm [thread:$0]  %s87_s18, 64, %s303_s3, [#allocation4], %s214_s0, %s214_s0, %s215_s9   ;;  %v65_v20 = vadd.f32 1.0, %v64_v19 }
  0x45   :  { %v46_v24 = vld [vmem:[%s302_s2] sm:$0x3]  ;;  %s217_s5 = smov [#allocation8]  }
  0x46   :  { %v66_v21 = vand.u32 2147483647, %v65_v20  ;;  %s99_s6 = sshll.u32 %s217_s5, 4  ;;  %s100_s6 = int_to_ptr.vmem [resolvable:$true] %s99_s6 }
  0x47   :  { %s182_s7 = scalar_lea.vmem %s100_s6, 32  ;;  %p187_p6 = scmp.lt.s32.totalorder %s100_s6, %s100_s6 }
  0x48   :  { %v67_v22 = vadd.f32 1e-06, %v66_v21  ;;  %p183_p5 = scmp.ne.s32.totalorder %s100_s6, %s182_s7  ;;  %p188_p7 = scmp.lt.s32.totalorder %s182_s7, %s182_s7 }
  0x4a   :  { %126 = vlog2.f32 %v67_v22  ;;  %p189_p8 = por %p188_p7, %p187_p6 }
  0x4c   :  { %p190_p9 = pnand %p189_p8, %p183_p5 }
  0x54   :  { %v127_v23 = vpop.eup %126 }
  0x55   :  { %v69_v25 = vmul.f32 0.6931472, %v127_v23 }
  0x57   :  { %v70_v26 = vadd.f32 %v69_v25, %v46_v24 }
  0x59   :  { %80 = vst [vmem:[#allocation8] sm:$0x3] %v70_v26 }
  0x5a   :  { %193 = shalt.err (!%p190_p9)
}
  0x5b   :  { %s194_s0 = scalar_lea.hbm %s304_s4, 32 }
  0x5c   :  { %p195_p10 = scmp.ne.s32.totalorder %s304_s4, %s194_s0  ;;  %p198_p11 = scmp.lt.u32.totalorder %s194_s0, %s304_s4 }
  0x5e   :  { %p200_p12 = pnand %p198_p11, %p195_p10 }
  0x60   :  { %203 = shalt.err (!%p200_p12)
}
  0x61   :  { %102 = dma.vmem_to_hbm [thread:$0]  %s100_s6, 32, %s304_s4, [#allocation9]  }
  0x62   :  { %208 = dma.done.wait [#allocation4], 64  }
  0x63   :  { %209 = vsyncadd [#allocation4], 4294967232 }
  0x64   :  { %210 = dma.done.wait [#allocation9], 32  }
  0x65   :  { %211 = vsyncadd [#allocation9], 4294967264 }
  0x66   :  { %109 = vsyncpa [#allocation3], 1 }
  0x67   :  { %110 = vsyncpa [#allocation4], 1 }
  0x68   :  { %111 = vsyncpa [#allocation9], 1 }
  0x69   :  { %112 = vsyncpa [#allocation5], 1 }

</bundles_post_ra>
